<compile_context>
chip_gen: v5e
topology: v5e:2x2
jax: 0.10.0
libtpu: 0.0.40
codegen_flags: <defaults>
</compile_context>

<pallas_src>
import functools

import jax
import jax.numpy as jnp
from jax.experimental import pallas as pl
from jax.experimental.pallas import tpu as pltpu

BN_EPS = 1e-5
CIN = 3                                     # RGB input channels
FEAT_DIM = 128                              # stand-in for resnet.fc.in_features (2048)
EMBED_DIM = 32                              # embedding_size
EMBED_PAD = 128                             # lane-dense padded embedding width
KPAD = max(128, -(-9 * CIN // 128) * 128)   # im2col contraction depth, padded to 128
SPATIAL_TILE = 128                          # pixels processed per grid step


def fused_cnn_kernel(patches_ref, cw_ref, cb_ref, lw_ref, lb_ref, g_ref, bt_ref,
                     o_ref, acc_ref, *, n_valid, s_tile, inv_hw):
    """One grid step = one spatial tile of the im2col'd image.

    patches_ref: (B, S_TILE, KPAD)     bf16 im2col taps (K and tail rows zero-padded)
    cw_ref:      (KPAD, FEAT_DIM)      bf16 packed 3x3 conv weight
    cb_ref:      (1, FEAT_DIM)         f32 conv bias
    lw_ref:      (FEAT_DIM, EMBED_PAD) f32 pre-transposed, zero-padded Linear weight
    lb/g/bt:     (1, EMBED_PAD)        f32 Linear bias, BN gamma, BN beta (padded)
    o_ref:       (B, EMBED_PAD)        f32 lane-dense output (cols >= EMBED_DIM stay 0)
    acc_ref:     (B, FEAT_DIM)         f32 running sum of post-ReLU activations
    """
    s = pl.program_id(0)

    @pl.when(s == 0)
    def _init():
        acc_ref[...] = jnp.zeros_like(acc_ref)

    # Whole 3x3 conv for this tile as a single K=128 bf16 MXU matmul, f32 accumulation.
    pre = jax.lax.dot_general(
        patches_ref[...], cw_ref[...],
        dimension_numbers=(((2,), (0,)), ((), ())),
        preferred_element_type=jnp.float32)              # (B, S_TILE, FEAT_DIM)
    act = jnp.maximum(pre + cb_ref[...][None], 0.0)      # bias + ReLU in f32

    if n_valid % s_tile != 0:                            # mask zero-padded tail pixels
        row = jax.lax.broadcasted_iota(jnp.int32, (1, s_tile, 1), 1) + s * s_tile
        act = jnp.where(row < n_valid, act, 0.0)

    acc_ref[...] += jnp.sum(act, axis=1)                 # partial global-avg-pool sums

    @pl.when(s == pl.num_programs(0) - 1)
    def _finalize():
        feats = acc_ref[...] * inv_hw                    # (B, FEAT_DIM) pooled features
        y = jnp.dot(feats, lw_ref[...],
                    preferred_element_type=jnp.float32) + lb_ref[...]
        # BatchNorm1d, training-mode batch statistics (biased variance, affine).
        mu = jnp.mean(y, axis=0, keepdims=True)
        diff = y - mu
        var = jnp.mean(diff * diff, axis=0, keepdims=True)
        y_hat = diff * jax.lax.rsqrt(var + BN_EPS)
        o_ref[...] = y_hat * g_ref[...] + bt_ref[...]


def cnn_model_forward(images_nchw, params):
    """Forward pass matching CNNModel.forward on PyTorch-style NCHW input."""
    B, C, H, W = images_nchw.shape
    S = H * W
    s_tile = SPATIAL_TILE if S >= SPATIAL_TILE else max(8, ((S + 7) // 8) * 8)
    num_tiles = pl.cdiv(S, s_tile)
    s_pad = num_tiles * s_tile

    # im2col ('same' 3x3 conv taps) built in XLA glue; cheap at this size.
    x = jnp.transpose(images_nchw, (0, 2, 3, 1)).astype(jnp.float32)   # NHWC
    xp = jnp.pad(x, ((0, 0), (1, 1), (1, 1), (0, 0)))
    taps = [xp[:, kh:kh + H, kw:kw + W, :] for kh in range(3) for kw in range(3)]
    patches = jnp.concatenate(taps, axis=-1).reshape(B, S, 9 * C)
    patches = jnp.pad(patches, ((0, 0), (0, s_pad - S), (0, KPAD - 9 * C)))
    patches = patches.astype(jnp.bfloat16)                             # bf16 MXU operands

    kernel = functools.partial(fused_cnn_kernel,
                               n_valid=S, s_tile=s_tile, inv_hw=1.0 / S)

    out_pad = pl.pallas_call(
        kernel,
        out_shape=jax.ShapeDtypeStruct((B, EMBED_PAD), jnp.float32),
        grid_spec=pltpu.PrefetchScalarGridSpec(
            num_scalar_prefetch=0,
            grid=(num_tiles,),
            in_specs=[
                pl.BlockSpec((B, s_tile, KPAD), lambda s: (0, s, 0)),   # pipelined tiles
                pl.BlockSpec((KPAD, FEAT_DIM), lambda s: (0, 0)),
                pl.BlockSpec((1, FEAT_DIM), lambda s: (0, 0)),
                pl.BlockSpec((FEAT_DIM, EMBED_PAD), lambda s: (0, 0)),
                pl.BlockSpec((1, EMBED_PAD), lambda s: (0, 0)),
                pl.BlockSpec((1, EMBED_PAD), lambda s: (0, 0)),
                pl.BlockSpec((1, EMBED_PAD), lambda s: (0, 0)),
            ],
            out_specs=pl.BlockSpec((B, EMBED_PAD), lambda s: (0, 0)),
            scratch_shapes=[pltpu.VMEM((B, FEAT_DIM), jnp.float32)],
        ),
        compiler_params=pltpu.CompilerParams(
            dimension_semantics=("arbitrary",)),   # spatial axis is a reduction
    )(patches, params["conv_w"], params["conv_b"],
      params["lin_w"], params["lin_b"], params["bn_gamma"], params["bn_beta"])

    return out_pad[:, :EMBED_DIM]


def init_params(key):
    k1, k2, k3, k4 = jax.random.split(key, 4)
    conv_w = jax.random.normal(k1, (3, 3, CIN, FEAT_DIM), jnp.float32) * 0.1
    conv_b = jax.random.normal(k2, (1, FEAT_DIM), jnp.float32) * 0.1
    lin_w = jax.random.normal(k3, (EMBED_DIM, FEAT_DIM), jnp.float32) / jnp.sqrt(FEAT_DIM)
    lin_b = jax.random.normal(k4, (1, EMBED_DIM), jnp.float32) * 0.01
    bn_gamma = jnp.ones((1, EMBED_DIM), jnp.float32)   # nn.BatchNorm1d default affine
    bn_beta = jnp.zeros((1, EMBED_DIM), jnp.float32)

    # --- one-time packing into TPU-friendly layouts (no per-call weight glue) ---
    k = 9 * CIN
    cw = conv_w.reshape(k, FEAT_DIM)                                    # tap order (kh,kw,c)
    cw = jnp.pad(cw, ((0, KPAD - k), (0, 0))).astype(jnp.bfloat16)      # (KPAD, FEAT) bf16
    lw = jnp.pad(jnp.transpose(lin_w), ((0, 0), (0, EMBED_PAD - EMBED_DIM)))
    lb = jnp.pad(lin_b, ((0, 0), (0, EMBED_PAD - EMBED_DIM)))
    g = jnp.pad(bn_gamma, ((0, 0), (0, EMBED_PAD - EMBED_DIM)), constant_values=1.0)
    bt = jnp.pad(bn_beta, ((0, 0), (0, EMBED_PAD - EMBED_DIM)))
    return dict(conv_w=cw, conv_b=conv_b, lin_w=lw, lin_b=lb, bn_gamma=g, bn_beta=bt)


if __name__ == "__main__":
    key = jax.random.PRNGKey(0)
    k_img, k_par = jax.random.split(key)
    images = jax.random.normal(k_img, (2, CIN, 16, 16), jnp.float32)   # NCHW like PyTorch
    params = init_params(k_par)

    fwd = jax.jit(cnn_model_forward)
    out = fwd(images, params)
    jax.block_until_ready(out)
    assert out.shape == (2, EMBED_DIM) and out.dtype == jnp.float32
    assert bool(jnp.all(jnp.isfinite(out)))
    print("KERNEL_OK")
</pallas_src>

<mosaic_0001>
module attributes {stable_mosaic.version = 11 : i64} {
  func.func @fused_cnn_kernel(%arg0: i32, %arg1: memref<2x128x128xbf16, #tpu.memory_space<vmem>>, %arg2: memref<128x128xbf16, #tpu.memory_space<vmem>>, %arg3: memref<1x128xf32, #tpu.memory_space<vmem>>, %arg4: memref<128x128xf32, #tpu.memory_space<vmem>>, %arg5: memref<1x128xf32, #tpu.memory_space<vmem>>, %arg6: memref<1x128xf32, #tpu.memory_space<vmem>>, %arg7: memref<1x128xf32, #tpu.memory_space<vmem>>, %arg8: memref<2x128xf32, #tpu.memory_space<vmem>>, %arg9: memref<2x128xf32, #tpu.memory_space<vmem>>) attributes {dimension_semantics = [#tpu.dimension_semantics<arbitrary>], iteration_bounds = array<i64: 2>, scalar_prefetch = 0 : i64, scratch_operands = 1 : i64, tpu.core_type = #tpu.core_type<tc>, window_params = [{transform_indices = @transform_0, window_bounds = array<i64: 2, 128, 128>}, {pipeline_mode = #tpu.pipeline_mode<synchronous>, transform_indices = @transform_1, window_bounds = array<i64: 128, 128>}, {pipeline_mode = #tpu.pipeline_mode<synchronous>, transform_indices = @transform_2, window_bounds = array<i64: 1, 128>}, {pipeline_mode = #tpu.pipeline_mode<synchronous>, transform_indices = @transform_3, window_bounds = array<i64: 128, 128>}, {pipeline_mode = #tpu.pipeline_mode<synchronous>, transform_indices = @transform_4, window_bounds = array<i64: 1, 128>}, {pipeline_mode = #tpu.pipeline_mode<synchronous>, transform_indices = @transform_5, window_bounds = array<i64: 1, 128>}, {pipeline_mode = #tpu.pipeline_mode<synchronous>, transform_indices = @transform_6, window_bounds = array<i64: 1, 128>}, {pipeline_mode = #tpu.pipeline_mode<synchronous>, transform_indices = @transform_7, window_bounds = array<i64: 2, 128>}]} {
    %c0_i32 = arith.constant 0 : i32
    %0 = arith.cmpi eq, %arg0, %c0_i32 : i32
    %1 = arith.extui %0 : i1 to i32
    %c0_i32_0 = arith.constant 0 : i32
    %2 = arith.cmpi ne, %1, %c0_i32_0 : i32
    scf.if %2 {
      %cst_14 = arith.constant 0.000000e+00 : f32
      %19 = vector.broadcast %cst_14 : f32 to vector<2x128xf32>
      %c0_15 = arith.constant 0 : index
      %c0_16 = arith.constant 0 : index
      %20 = vector.load %arg9[%c0_15, %c0_16] : memref<2x128xf32, #tpu.memory_space<vmem>>, vector<2x128xf32>
      tpu.vector_store %arg9[%c0_15, %c0_16], %19 {strides = array<i32>} : memref<2x128xf32, #tpu.memory_space<vmem>>, vector<2x128xf32>,
    } else {
    }
    %c0 = arith.constant 0 : index
    %c0_1 = arith.constant 0 : index
    %c0_2 = arith.constant 0 : index
    %3 = vector.load %arg1[%c0, %c0_1, %c0_2] : memref<2x128x128xbf16, #tpu.memory_space<vmem>>, vector<2x128x128xbf16>
    %c0_3 = arith.constant 0 : index
    %c0_4 = arith.constant 0 : index
    %4 = vector.load %arg2[%c0_3, %c0_4] : memref<128x128xbf16, #tpu.memory_space<vmem>>, vector<128x128xbf16>
    %cst = arith.constant dense<0.000000e+00> : vector<2x128x128xf32>
    %5 = tpu.matmul %3, %4, %cst {dimension_numbers = #tpu.dot_dimension_numbers<[2], [0], [0, 1], [1], [0, 0, 0, 1, 1, 1], [], []>} : vector<2x128x128xbf16>, vector<128x128xbf16>, vector<2x128x128xf32> -> vector<2x128x128xf32>
    %c0_5 = arith.constant 0 : index
    %c0_6 = arith.constant 0 : index
    %6 = vector.load %arg3[%c0_5, %c0_6] : memref<1x128xf32, #tpu.memory_space<vmem>>, vector<1x128xf32>
    %7 = vector.shape_cast %6 : vector<1x128xf32> to vector<1x1x128xf32>
    %8 = vector.broadcast %7 : vector<1x1x128xf32> to vector<2x128x128xf32>
    %9 = arith.addf %5, %8 : vector<2x128x128xf32>
    %cst_7 = arith.constant 0.000000e+00 : f32
    %10 = vector.broadcast %cst_7 : f32 to vector<2x128x128xf32>
    %11 = arith.maximumf %9, %10 : vector<2x128x128xf32>
    %c0_8 = arith.constant 0 : index
    %c0_9 = arith.constant 0 : index
    %12 = vector.load %arg9[%c0_8, %c0_9] : memref<2x128xf32, #tpu.memory_space<vmem>>, vector<2x128xf32>
    %cst_10 = arith.constant dense<0.000000e+00> : vector<2x128xf32>
    %13 = vector.multi_reduction <add>, %11, %cst_10 [1] : vector<2x128x128xf32> to vector<2x128xf32>
    %14 = arith.addf %12, %13 : vector<2x128xf32>
    %c0_11 = arith.constant 0 : index
    %c0_12 = arith.constant 0 : index
    %15 = vector.load %arg9[%c0_11, %c0_12] : memref<2x128xf32, #tpu.memory_space<vmem>>, vector<2x128xf32>
    tpu.vector_store %arg9[%c0_11, %c0_12], %14 {strides = array<i32>} : memref<2x128xf32, #tpu.memory_space<vmem>>, vector<2x128xf32>,
    %c1_i32 = arith.constant 1 : i32
    %16 = arith.cmpi eq, %arg0, %c1_i32 : i32
    %17 = arith.extui %16 : i1 to i32
    %c0_i32_13 = arith.constant 0 : i32
    %18 = arith.cmpi ne, %17, %c0_i32_13 : i32
    scf.if %18 {
      %c0_14 = arith.constant 0 : index
      %c0_15 = arith.constant 0 : index
      %19 = vector.load %arg9[%c0_14, %c0_15] : memref<2x128xf32, #tpu.memory_space<vmem>>, vector<2x128xf32>
      %cst_16 = arith.constant 3.906250e-03 : f32
      %20 = vector.broadcast %cst_16 : f32 to vector<2x128xf32>
      %21 = arith.mulf %19, %20 : vector<2x128xf32>
      %c0_17 = arith.constant 0 : index
      %c0_18 = arith.constant 0 : index
      %22 = vector.load %arg4[%c0_17, %c0_18] : memref<128x128xf32, #tpu.memory_space<vmem>>, vector<128x128xf32>
      %cst_19 = arith.constant dense<0.000000e+00> : vector<2x128xf32>
      %23 = tpu.matmul %21, %22, %cst_19 {dimension_numbers = #tpu.dot_dimension_numbers<[1], [0], [0], [1], [0, 0, 1, 1], [], []>} : vector<2x128xf32>, vector<128x128xf32>, vector<2x128xf32> -> vector<2x128xf32>
      %c0_20 = arith.constant 0 : index
      %c0_21 = arith.constant 0 : index
      %24 = vector.load %arg5[%c0_20, %c0_21] : memref<1x128xf32, #tpu.memory_space<vmem>>, vector<1x128xf32>
      %25 = vector.broadcast %24 : vector<1x128xf32> to vector<2x128xf32>
      %26 = arith.addf %23, %25 : vector<2x128xf32>
      %cst_22 = arith.constant dense<0.000000e+00> : vector<128xf32>
      %27 = vector.multi_reduction <add>, %26, %cst_22 [0] : vector<2x128xf32> to vector<128xf32>
      %28 = vector.shape_cast %27 : vector<128xf32> to vector<1x128xf32>
      %cst_23 = arith.constant 2.000000e+00 : f32
      %29 = vector.broadcast %cst_23 : f32 to vector<1x128xf32>
      %30 = arith.divf %28, %29 : vector<1x128xf32>
      %31 = vector.broadcast %30 : vector<1x128xf32> to vector<2x128xf32>
      %32 = arith.subf %26, %31 : vector<2x128xf32>
      %33 = arith.mulf %32, %32 : vector<2x128xf32>
      %cst_24 = arith.constant dense<0.000000e+00> : vector<128xf32>
      %34 = vector.multi_reduction <add>, %33, %cst_24 [0] : vector<2x128xf32> to vector<128xf32>
      %35 = vector.shape_cast %34 : vector<128xf32> to vector<1x128xf32>
      %cst_25 = arith.constant 2.000000e+00 : f32
      %36 = vector.broadcast %cst_25 : f32 to vector<1x128xf32>
      %37 = arith.divf %35, %36 : vector<1x128xf32>
      %cst_26 = arith.constant 9.99999974E-6 : f32
      %38 = vector.broadcast %cst_26 : f32 to vector<1x128xf32>
      %39 = arith.addf %37, %38 : vector<1x128xf32>
      %40 = math.rsqrt %39 : vector<1x128xf32>
      %41 = vector.broadcast %40 : vector<1x128xf32> to vector<2x128xf32>
      %42 = arith.mulf %32, %41 : vector<2x128xf32>
      %c0_27 = arith.constant 0 : index
      %c0_28 = arith.constant 0 : index
      %43 = vector.load %arg6[%c0_27, %c0_28] : memref<1x128xf32, #tpu.memory_space<vmem>>, vector<1x128xf32>
      %44 = vector.broadcast %43 : vector<1x128xf32> to vector<2x128xf32>
      %45 = arith.mulf %42, %44 : vector<2x128xf32>
      %c0_29 = arith.constant 0 : index
      %c0_30 = arith.constant 0 : index
      %46 = vector.load %arg7[%c0_29, %c0_30] : memref<1x128xf32, #tpu.memory_space<vmem>>, vector<1x128xf32>
      %47 = vector.broadcast %46 : vector<1x128xf32> to vector<2x128xf32>
      %48 = arith.addf %45, %47 : vector<2x128xf32>
      %c0_31 = arith.constant 0 : index
      %c0_32 = arith.constant 0 : index
      %49 = vector.load %arg8[%c0_31, %c0_32] : memref<2x128xf32, #tpu.memory_space<vmem>>, vector<2x128xf32>
      tpu.vector_store %arg8[%c0_31, %c0_32], %48 {strides = array<i32>} : memref<2x128xf32, #tpu.memory_space<vmem>>, vector<2x128xf32>,
    } else {
    }
    return
  }
  func.func @transform_0(%arg0: i32) -> (i32, i32, i32) {
    %c0_i32 = arith.constant 0 : i32
    %c0_i32_0 = arith.constant 0 : i32
    %c0_i32_1 = arith.constant 0 : i32
    return %c0_i32, %arg0, %c0_i32_0 : i32, i32, i32
  }
  func.func @transform_1(%arg0: i32) -> (i32, i32) {
    %c0_i32 = arith.constant 0 : i32
    %c0_i32_0 = arith.constant 0 : i32
    %c0_i32_1 = arith.constant 0 : i32
    return %c0_i32, %c0_i32_0 : i32, i32
  }
  func.func @transform_2(%arg0: i32) -> (i32, i32) {
    %c0_i32 = arith.constant 0 : i32
    %c0_i32_0 = arith.constant 0 : i32
    %c0_i32_1 = arith.constant 0 : i32
    return %c0_i32, %c0_i32_0 : i32, i32
  }
  func.func @transform_3(%arg0: i32) -> (i32, i32) {
    %c0_i32 = arith.constant 0 : i32
    %c0_i32_0 = arith.constant 0 : i32
    %c0_i32_1 = arith.constant 0 : i32
    return %c0_i32, %c0_i32_0 : i32, i32
  }
  func.func @transform_4(%arg0: i32) -> (i32, i32) {
    %c0_i32 = arith.constant 0 : i32
    %c0_i32_0 = arith.constant 0 : i32
    %c0_i32_1 = arith.constant 0 : i32
    return %c0_i32, %c0_i32_0 : i32, i32
  }
  func.func @transform_5(%arg0: i32) -> (i32, i32) {
    %c0_i32 = arith.constant 0 : i32
    %c0_i32_0 = arith.constant 0 : i32
    %c0_i32_1 = arith.constant 0 : i32
    return %c0_i32, %c0_i32_0 : i32, i32
  }
  func.func @transform_6(%arg0: i32) -> (i32, i32) {
    %c0_i32 = arith.constant 0 : i32
    %c0_i32_0 = arith.constant 0 : i32
    %c0_i32_1 = arith.constant 0 : i32
    return %c0_i32, %c0_i32_0 : i32, i32
  }
  func.func @transform_7(%arg0: i32) -> (i32, i32) {
    %c0_i32 = arith.constant 0 : i32
    %c0_i32_0 = arith.constant 0 : i32
    %c0_i32_1 = arith.constant 0 : i32
    return %c0_i32, %c0_i32_0 : i32, i32
  }
}

</mosaic_0001>

<bundles_post_ra>
// kernel: cnn_model_forward.1
= control target key start
LH: loop header
LB: loop body
LE: loop exit
PB: predicated region body
PF: predicated region fallthrough
CT: control target
= control target key end

     0   :  { %12 = vsyncpa [#allocation5], 0  ;;  %s1254_s24 = smov 0   ;;  %s1256_s25 = smov 0   ;;  %s1486_s0 = inlined_call_operand.vmem [shape: bf16[2,256,128], index: 0, kind: input, shape index: {}]   ;;  %s1487_s1 = inlined_call_operand.vmem [shape: bf16[128,128], index: 1, kind: input, shape index: {}]   ;;  %s1488_s2 = inlined_call_operand.vmem [shape: f32[1,128], index: 2, kind: input, shape index: {}]   ;;  %s1489_s3 = inlined_call_operand.vmem [shape: f32[128,128], index: 3, kind: input, shape index: {}]   ;;  %s1490_s4 = inlined_call_operand.vmem [shape: f32[1,128], index: 4, kind: input, shape index: {}]   ;;  %s1491_s5 = inlined_call_operand.vmem [shape: f32[1,128], index: 5, kind: input, shape index: {}]   ;;  %s1492_s6 = inlined_call_operand.vmem [shape: f32[1,128], index: 6, kind: input, shape index: {}]   ;;  %s1493_s7 = inlined_call_operand.hbm [shape: f32[2,128], index: 7, kind: output, shape index: {}]  }
   0x1   :  { %s1258_s26 = smov 0  }
   0x2 LB: > { %s1270_s27 = sadd.s32 4294967295, %s1209_s26   ;;  %s1273_s28 = sadd.s32 1, %s1209_s26   ;;  %s1209_s26 = sphi %s1258_s26, %s1496_s26   ;;  %s1205_s25 = sphi %s1256_s25, %s1495_s25   ;;  %s1201_s24 = sphi %s1254_s24, %s1494_s24  }
   0x3   : > { %s22_s29 = ssub.s32 %s1209_s26, %s1273_s28  ;;  %s25_s30 = sadd.s32 1, %s1205_s25 }
   0x4   : > { %p23_p0 = scmp.eq.s32.totalorder %s22_s29, 0  ;;  %p32_p1 = scmp.ne.s32.totalorder %s1205_s25, %s1201_s24 }
   0x5   : > { %p33_p2 = scmp.eq.s32.totalorder %s1209_s26, 0  ;;  %p957_p4 = scmp.ge.s32.totalorder %s1209_s26, 2 }
   0x6   : > { %s1282_s8 = scalar_select %p23_p0, %s1205_s25, %s25_s30  }
   0x7   : > { %p34_p3 = por %p33_p2, %p32_p1  ;;  %223 = sbr.rel (%p957_p4) target bundleno = 32 (0x20), region = 40 }
   0xc   : > { %226 = sbr.rel (!%p34_p3) target bundleno = 32 (0x20), region = 44  ;;  %s228_s9 = sand.u32 (%p34_p3), 1, %s1205_s25  }
   0xd   : > { %s1065_s10 = sshll.u32 (%p34_p3), %s1209_s26, 6  ;;  %s958_s11 = sshll.u32 (%p34_p3), %s228_s9, 7 }
   0xe   : > { %s1290_s14 = scalar_lea.vmem (%p34_p3), %s1486_s0, %s1065_s10  ;;  %s230_s15 = scalar_lea.vmem (%p34_p3), [#allocation3], %s958_s11 }
   0xf   : > { %v250_v0 = vld [vmem:[%s1290_s14] sm:$0xff] (%p34_p3)   ;;  %v254_v1 = vld [vmem:[%s1290_s14 + $0x8] sm:$0xff] (%p34_p3)   ;;  %v258_v2 = vld [vmem:[%s1290_s14 + $0x10] sm:$0xff] (%p34_p3)  }
  0x10   : > { %251 = vst [vmem:[%s230_s15] sm:$0xff] (%p34_p3), %v250_v0   ;;  %v262_v3 = vld [vmem:[%s1290_s14 + $0x18] sm:$0xff] (%p34_p3)   ;;  %v266_v4 = vld [vmem:[%s1290_s14 + $0x20] sm:$0xff] (%p34_p3)   ;;  %v270_v5 = vld [vmem:[%s1290_s14 + $0x28] sm:$0xff] (%p34_p3)  }
  0x11   : > { %255 = vst [vmem:[%s230_s15 + $0x8] sm:$0xff] %v254_v1   ;;  %v274_v6 = vld [vmem:[%s1290_s14 + $0x30] sm:$0xff]   ;;  %v278_v7 = vld [vmem:[%s1290_s14 + $0x38] sm:$0xff]   ;;  %v282_v8 = vld [vmem:[%s1290_s14 + $0x80] sm:$0xff]  }
  0x12   : > { %259 = vst [vmem:[%s230_s15 + $0x10] sm:$0xff] %v258_v2   ;;  %v286_v9 = vld [vmem:[%s1290_s14 + $0x88] sm:$0xff]   ;;  %v290_v10 = vld [vmem:[%s1290_s14 + $0x90] sm:$0xff]   ;;  %v294_v11 = vld [vmem:[%s1290_s14 + $0x98] sm:$0xff]  }
  0x13   : > { %263 = vst [vmem:[%s230_s15 + $0x18] sm:$0xff] %v262_v3   ;;  %v298_v12 = vld [vmem:[%s1290_s14 + $0xa0] sm:$0xff]   ;;  %v302_v13 = vld [vmem:[%s1290_s14 + $0xa8] sm:$0xff]   ;;  %v306_v14 = vld [vmem:[%s1290_s14 + $0xb0] sm:$0xff]  }
  0x14   : > { %267 = vst [vmem:[%s230_s15 + $0x20] sm:$0xff] %v266_v4   ;;  %v310_v15 = vld [vmem:[%s1290_s14 + $0xb8] sm:$0xff]  }
  0x15   : > { %271 = vst [vmem:[%s230_s15 + $0x28] sm:$0xff] %v270_v5  }
  0x16   : > { %275 = vst [vmem:[%s230_s15 + $0x30] sm:$0xff] %v274_v6  }
  0x17   : > { %279 = vst [vmem:[%s230_s15 + $0x38] sm:$0xff] %v278_v7  }
  0x18   : > { %283 = vst [vmem:[%s230_s15 + $0x40] sm:$0xff] %v282_v8  }
  0x19   : > { %287 = vst [vmem:[%s230_s15 + $0x48] sm:$0xff] %v286_v9  }
  0x1a   : > { %291 = vst [vmem:[%s230_s15 + $0x50] sm:$0xff] %v290_v10  }
  0x1b   : > { %295 = vst [vmem:[%s230_s15 + $0x58] sm:$0xff] %v294_v11  }
  0x1c   : > { %299 = vst [vmem:[%s230_s15 + $0x60] sm:$0xff] %v298_v12  }
  0x1d   : > { %303 = vst [vmem:[%s230_s15 + $0x68] sm:$0xff] %v302_v13  }
  0x1e   : > { %307 = vst [vmem:[%s230_s15 + $0x70] sm:$0xff] %v306_v14  }
  0x1f   : > { %311 = vst [vmem:[%s230_s15 + $0x78] sm:$0xff] %v310_v15  }
  0x20 PF: > { %p961_p5 = scmp.ge.s32.totalorder %s1209_s26, 1  ;;  %p400_p6 = scmp.lt.s32.totalorder %s1209_s26, 3 }
  0x22   : > { %p401_p7 = pnand %p961_p5, %p400_p6 }
  0x23   : > { %s407_s16 = sand.u32 (!%p401_p7), 1, %s1201_s24   ;;  %p963_p8 = scmp.ne.s32.totalorder (!%p401_p7), %s1270_s27, 0 }
  0x24   : > { %404 = sbr.rel (%p401_p7) target bundleno = 532 (0x214), region = 85  ;;  %s962_s17 = sshll.u32 (!%p401_p7), %s407_s16, 7 }
  0x25   : > { %s1311_s18 = scalar_lea.vmem (!%p401_p7), [#allocation3], %s962_s17 }
  0x29   : > { %437 = sbr.rel (%p963_p8) target bundleno = 48 (0x30), region = 93 }
  0x2e   : > { %v1211_v16 = vmov 0.0  }
  0x2f   : > { %438 = vst [vmem:[#allocation2] sm:$0x3] %v1211_v16 }
  0x30 PF: > { %v1089_v17 = vld [vmem:[%s1487_s1 + $0x38] sm:$0xff]  ;;  %v1088_v18 = vld [vmem:[%s1487_s1 + $0x30] sm:$0xff]  ;;  %v1087_v19 = vld [vmem:[%s1487_s1 + $0x28] sm:$0xff]  ;;  %vm801_vm0 = vcmask 1041409   ;;  %p1060_p9 = scmp.ne.s32.totalorder %s1270_s27, 1 }
  0x31   : > { %635 = vmatpush.bf16.msra.mxu0 %v1089_v17  ;;  %1091 = vmatpush.bf16.msra.mxu2 %v1089_v17  ;;  %v1086_v20 = vld [vmem:[%s1487_s1 + $0x20] sm:$0xff]  ;;  %v1085_v21 = vld [vmem:[%s1487_s1 + $0x18] sm:$0xff]  ;;  %v1084_v22 = vld [vmem:[%s1487_s1 + $0x10] sm:$0xff] }
  0x32   : > { %1092 = vmatpush.bf16.msra.mxu3 %v1089_v17  ;;  %1090 = vmatpush.bf16.msra.mxu1 %v1089_v17  ;;  %v1083_v23 = vld [vmem:[%s1487_s1 + $0x8] sm:$0xff]  ;;  %v1082_v24 = vld [vmem:[%s1487_s1] sm:$0xff]  ;;  %v1068_v33 = vld [vmem:[%s1311_s18 + $0x10] sm:$0xff] }
  0x33   : > { %v1066_v25 = vld [vmem:[%s1311_s18] sm:$0xff]  ;;  %v1067_v29 = vld [vmem:[%s1311_s18 + $0x8] sm:$0xff]  ;;  %v1076_v34 = vld [vmem:[%s1311_s18 + $0x50] sm:$0xff] }
  0x34   : > { %v1074_v26 = vld [vmem:[%s1311_s18 + $0x40] sm:$0xff]  ;;  %v1075_v30 = vld [vmem:[%s1311_s18 + $0x48] sm:$0xff]  ;;  %v1080_v35 = vld [vmem:[%s1311_s18 + $0x70] sm:$0xff] }
  0x35   : > { %636 = vmatpush.bf16.msra.mxu0 %v1088_v18  ;;  %1094 = vmatpush.bf16.msra.mxu2 %v1088_v18  ;;  %v1078_v27 = vld [vmem:[%s1311_s18 + $0x60] sm:$0xff]  ;;  %v1079_v31 = vld [vmem:[%s1311_s18 + $0x68] sm:$0xff]  ;;  %v1072_v36 = vld [vmem:[%s1311_s18 + $0x30] sm:$0xff] }
  0x36   : > { %1095 = vmatpush.bf16.msra.mxu3 %v1088_v18  ;;  %1093 = vmatpush.bf16.msra.mxu1 %v1088_v18  ;;  %v1070_v28 = vld [vmem:[%s1311_s18 + $0x20] sm:$0xff]  ;;  %v1071_v32 = vld [vmem:[%s1311_s18 + $0x28] sm:$0xff]  ;;  %v1069_v37 = vld [vmem:[%s1311_s18 + $0x18] sm:$0xff] }
  0x37   : > { %v1077_v38 = vld [vmem:[%s1311_s18 + $0x58] sm:$0xff] }
  0x38   : > { %v1081_v39 = vld [vmem:[%s1311_s18 + $0x78] sm:$0xff] }
  0x39   : > { %637 = vmatpush.bf16.msra.mxu0 %v1087_v19  ;;  %1097 = vmatpush.bf16.msra.mxu2 %v1087_v19  ;;  %v1073_v40 = vld [vmem:[%s1311_s18 + $0x38] sm:$0xff] }
  0x3a   : > { %1098 = vmatpush.bf16.msra.mxu3 %v1087_v19  ;;  %1096 = vmatpush.bf16.msra.mxu1 %v1087_v19  ;;  %v1369_v60 = vld [vmem:[%s1488_s2] ss:$0 sm:$0xff] }
  0x3d   : > { %638 = vmatpush.bf16.msra.mxu0 %v1086_v20  ;;  %1100 = vmatpush.bf16.msra.mxu2 %v1086_v20 }
  0x3e   : > { %1101 = vmatpush.bf16.msra.mxu3 %v1086_v20  ;;  %1099 = vmatpush.bf16.msra.mxu1 %v1086_v20 }
  0x41   : > { %639 = vmatpush.bf16.msra.mxu0 %v1085_v21  ;;  %1103 = vmatpush.bf16.msra.mxu2 %v1085_v21 }
  0x42   : > { %1104 = vmatpush.bf16.msra.mxu3 %v1085_v21  ;;  %1102 = vmatpush.bf16.msra.mxu1 %v1085_v21 }
  0x45   : > { %640 = vmatpush.bf16.msra.mxu0 %v1084_v22  ;;  %1106 = vmatpush.bf16.msra.mxu2 %v1084_v22 }
  0x46   : > { %1107 = vmatpush.bf16.msra.mxu3 %v1084_v22  ;;  %1105 = vmatpush.bf16.msra.mxu1 %v1084_v22 }
  0x49   : > { %641 = vmatpush.bf16.msra.mxu0 %v1083_v23  ;;  %1109 = vmatpush.bf16.msra.mxu2 %v1083_v23 }
  0x4a   : > { %1110 = vmatpush.bf16.msra.mxu3 %v1083_v23  ;;  %1108 = vmatpush.bf16.msra.mxu1 %v1083_v23 }
  0x4d   : > { %642 = vmatpush.bf16.msra.mxu0 %v1082_v24  ;;  %1112 = vmatpush.bf16.msra.mxu2 %v1082_v24 }
  0x4e   : > { %1113 = vmatpush.bf16.msra.mxu3 %v1082_v24  ;;  %1111 = vmatpush.bf16.msra.mxu1 %v1082_v24 }
  0x50   : > { %643 = vmatmul.bf16.vlgmr.msra.gmra.mxu0 %v1066_v25  ;;  %683 = vmatmul.bf16.vlgmr.msra.gmra.mxu2 %v1074_v26 }
  0x51   : > { %703 = vmatmul.bf16.vlgmr.msra.gmra.mxu3 %v1078_v27  ;;  %663 = vmatmul.bf16.vlgmr.msra.gmra.mxu1 %v1070_v28 }
  0x60   : > { %648 = vmatmul.bf16.gmra.mxu0 %v1067_v29  ;;  %688 = vmatmul.bf16.gmra.mxu2 %v1075_v30 }
  0x61   : > { %708 = vmatmul.bf16.gmra.mxu3 %v1079_v31  ;;  %668 = vmatmul.bf16.gmra.mxu1 %v1071_v32 }
  0x70   : > { %653 = vmatmul.bf16.gmra.mxu0 %v1068_v33  ;;  %693 = vmatmul.bf16.gmra.mxu2 %v1076_v34 }
  0x71   : > { %713 = vmatmul.bf16.gmra.mxu3 %v1080_v35  ;;  %673 = vmatmul.bf16.gmra.mxu1 %v1072_v36 }
  0x80   : > { %658 = vmatmul.bf16.gmra.mxu0 %v1069_v37  ;;  %698 = vmatmul.bf16.gmra.mxu2 %v1077_v38 }
  0x81   : > { %718 = vmatmul.bf16.gmra.mxu3 %v1081_v39  ;;  %678 = vmatmul.bf16.gmra.mxu1 %v1073_v40 }
  0xcd   : > { %v644_v41 = vpop.f32.mrf.mxu0 }
  0xce   : > { %v664_v42 = vpop.f32.mrf.mxu1  ;;  %v645_v63 = vadd.f32 %v1369_v60, %v644_v41 }
  0xcf   : > { %v665_v33 = vadd.f32 %v1369_v60, %v664_v42 }
  0xd0   : > { %v724_v6 = vmax.f32 %v645_v63, 0.0 }
  0xd3   : > { %v684_v43 = vpop.f32.mrf.mxu2 }
  0xd4   : > { %v1354_v44 = vpop.f32.mrf.mxu3  ;;  %v685_v9 = vadd.f32 %v1369_v60, %v684_v43 }
  0xd5   : > { %v646_v45 = vpop.f32.mrf.mxu0 }
  0xd6   : > { %v666_v46 = vpop.f32.mrf.mxu1  ;;  %v647_v62 = vadd.f32 %v1369_v60, %v646_v45  ;;  %v740_v21 = vmax.f32 %v685_v9, 0.0 }
  0xd7   : > { %v667_v40 = vadd.f32 %v1369_v60, %v666_v46 }
  0xd8   : > { %v725_v2 = vmax.f32 %v647_v62, 0.0 }
  0xda   : > { %v757_v13 = vadd.f32 %v725_v2, %v724_v6 }
  0xdb   : > { %v686_v47 = vpop.f32.mrf.mxu2 }
  0xdc   : > { %v1356_v48 = vpop.f32.mrf.mxu3  ;;  %v687_v4 = vadd.f32 %v1369_v60, %v686_v47 }
  0xdd   : > { %v649_v49 = vpop.f32.mrf.mxu0 }
  0xde   : > { %v669_v50 = vpop.f32.mrf.mxu1  ;;  %v650_v0 = vadd.f32 %v1369_v60, %v649_v49  ;;  %v741_v16 = vmax.f32 %v687_v4, 0.0 }
  0xe0   : > { %v726_v7 = vmax.f32 %v650_v0, 0.0  ;;  %v778_v26 = vadd.f32 %v741_v16, %v740_v21 }
  0xe2   : > { %v758_v17 = vadd.f32 %v757_v13, %v726_v7 }
  0xe3   : > { %v689_v51 = vpop.f32.mrf.mxu2 }
  0xe4   : > { %v1358_v53 = vpop.f32.mrf.mxu3  ;;  %v690_v10 = vadd.f32 %v1369_v60, %v689_v51  ;;  %v670_v51 = vadd.f32 %v1369_v60, %v669_v50 }
  0xe5   : > { %v651_v52 = vpop.f32.mrf.mxu0  ;;  %v710_v9 = vadd.f32 %v1369_v60, %v1358_v53 }
  0xe6   : > { %v1360_v54 = vpop.f32.mrf.mxu1  ;;  %v652_v3 = vadd.f32 %v1369_v60, %v651_v52  ;;  %v742_v22 = vmax.f32 %v690_v10, 0.0  ;;  %v732_v52 = vmax.f32 %v665_v33, 0.0  ;;  %v734_v50 = vmax.f32 %v670_v51, 0.0 }
  0xe7   : > { %v672_v63 = vadd.f32 %v1369_v60, %v1360_v54 }
  0xe8   : > { %v727_v14 = vmax.f32 %v652_v3, 0.0  ;;  %v779_v34 = vadd.f32 %v778_v26, %v742_v22  ;;  %v707_v3 = vadd.f32 %v1369_v60, %v1356_v48 }
  0xe9   : > { %v735_v10 = vmax.f32 %v672_v63, 0.0 }
  0xea   : > { %v759_v23 = vadd.f32 %v758_v17, %v727_v14  ;;  %v749_v48 = vmax.f32 %v707_v3, 0.0 }
  0xeb   : > { %v691_v55 = vpop.f32.mrf.mxu2 }
  0xec   : > { %v1362_v57 = vpop.f32.mrf.mxu3  ;;  %v692_v18 = vadd.f32 %v1369_v60, %v691_v55 }
  0xed   : > { %v654_v56 = vpop.f32.mrf.mxu0  ;;  %v712_v16 = vadd.f32 %v1369_v60, %v1362_v57 }
  0xee   : > { %v1364_v59 = vpop.f32.mrf.mxu1  ;;  %v655_v8 = vadd.f32 %v1369_v60, %v654_v56  ;;  %v743_v29 = vmax.f32 %v692_v18, 0.0 }
  0xf0   : > { %v728_v19 = vmax.f32 %v655_v8, 0.0  ;;  %v780_v43 = vadd.f32 %v779_v34, %v743_v29 }
  0xf2   : > { %v760_v30 = vadd.f32 %v759_v23, %v728_v19  ;;  %v750_v19 = vmax.f32 %v710_v9, 0.0 }
  0xf3   : > { %v694_v58 = vpop.f32.mrf.mxu2 }
  0xf4   : > { %v1374_v1 = vpop.f32.mrf.mxu3  ;;  %v695_v24 = vadd.f32 %v1369_v60, %v694_v58  ;;  %v705_v58 = vadd.f32 %v1369_v60, %v1354_v44 }
  0xf5   : > { %v656_v61 = vpop.f32.mrf.mxu0 }
  0xf6   : > { %v676_v12 = vpop.f32.mrf.mxu1  ;;  %v657_v15 = vadd.f32 %v1369_v60, %v656_v61  ;;  %v744_v36 = vmax.f32 %v695_v24, 0.0  ;;  %v733_v61 = vmax.f32 %v667_v40, 0.0  ;;  %v748_v8 = vmax.f32 %v705_v58, 0.0 }
  0xf7   : > { %v677_v54 = vadd.f32 %v1369_v60, %v676_v12  ;;  %v751_v24 = vmax.f32 %v712_v16, 0.0 }
  0xf8   : > { %v729_v25 = vmax.f32 %v657_v15, 0.0  ;;  %v781_v55 = vadd.f32 %v780_v43, %v744_v36 }
  0xf9   : > { %v737_v53 = vmax.f32 %v677_v54, 0.0 }
  0xfa   : > { %v761_v37 = vadd.f32 %v760_v30, %v729_v25 }
  0xfb   : > { %v696_v5 = vpop.f32.mrf.mxu2 }
  0xfc   : > { %v716_v28 = vpop.f32.mrf.mxu3  ;;  %v697_v31 = vadd.f32 %v1369_v60, %v696_v5  ;;  %v675_v5 = vadd.f32 %v1369_v60, %v1364_v59 }
  0xfd   : > { %v659_v11 = vpop.f32.mrf.mxu0  ;;  %v717_v25 = vadd.f32 %v1369_v60, %v716_v28 }
  0xfe   : > { %v660_v20 = vadd.f32 %v1369_v60, %v659_v11  ;;  %v679_v41 = vpop.f32.mrf.mxu1  ;;  %v745_v45 = vmax.f32 %v697_v31, 0.0  ;;  %v736_v59 = vmax.f32 %v675_v5, 0.0 }
  0xff   : > { %v680_v13 = vadd.f32 %v1369_v60, %v679_v41  ;;  %v753_v34 = vmax.f32 %v717_v25, 0.0 }
 0x100   : > { %v730_v32 = vmax.f32 %v660_v20, 0.0  ;;  %v782_v46 = vadd.f32 %v781_v55, %v745_v45  ;;  %v715_v20 = vadd.f32 %v1369_v60, %v1374_v1 }
 0x101   : > { %v738_v21 = vmax.f32 %v680_v13, 0.0 }
 0x102   : > { %v762_v47 = vadd.f32 %v761_v37, %v730_v32  ;;  %v752_v29 = vmax.f32 %v715_v20, 0.0 }
 0x103   : > { %v699_v27 = vpop.f32.mrf.mxu2 }
 0x104   : > { %v700_v38 = vadd.f32 %v1369_v60, %v699_v27  ;;  %v719_v4 = vpop.f32.mrf.mxu3 }
 0x105   : > { %v661_v35 = vpop.f32.mrf.mxu0  ;;  %v720_v31 = vadd.f32 %v1369_v60, %v719_v4 }
 0x106   : > { %v662_v39 = vadd.f32 %v1369_v60, %v661_v35  ;;  %v746_v42 = vmax.f32 %v700_v38, 0.0  ;;  %v681_v15 = vpop.f32.mrf.mxu1 }
 0x107   : > { %v682_v23 = vadd.f32 %v1369_v60, %v681_v15  ;;  %v754_v37 = vmax.f32 %v720_v31, 0.0 }
 0x108   : > { %v731_v49 = vmax.f32 %v662_v39, 0.0  ;;  %v783_v6 = vadd.f32 %v782_v46, %v746_v42 }
 0x109   : > { %v739_v33 = vmax.f32 %v682_v23, 0.0 }
 0x10a   : > { %v763_v56 = vadd.f32 %v762_v47, %v731_v49 }
 0x10b   : > { %v701_v62 = vpop.f32.mrf.mxu2 }
 0x10c   : > { %v764_v0 = vadd.f32 %v763_v56, %v732_v52  ;;  %v702_v2 = vadd.f32 %v1369_v60, %v701_v62  ;;  %v721_v57 = vpop.f32.mrf.mxu3 }
 0x10d   : > { %v722_v36 = vadd.f32 %v1369_v60, %v721_v57 }
 0x10e   : > { %v765_v7 = vadd.f32 %v764_v0, %v733_v61  ;;  %v747_v44 = vmax.f32 %v702_v2, 0.0  ;;  %v756_v61 = vld [vmem:[#allocation2] sm:$0x3] }
 0x10f   : > { %v755_v28 = vmax.f32 %v722_v36, 0.0 }
 0x110   : > { %v766_v11 = vadd.f32 %v765_v7, %v734_v50  ;;  %v784_v14 = vadd.f32 %v783_v6, %v747_v44 }
 0x112   : > { %v767_v17 = vadd.f32 %v766_v11, %v735_v10  ;;  %v785_v18 = vadd.f32 %v784_v14, %v748_v8 }
 0x114   : > { %v768_v12 = vadd.f32 %v767_v17, %v736_v59  ;;  %v786_v22 = vadd.f32 %v785_v18, %v749_v48 }
 0x116   : > { %v769_v26 = vadd.f32 %v768_v12, %v737_v53  ;;  %v787_v27 = vadd.f32 %v786_v22, %v750_v19 }
 0x118   : > { %v770_v30 = vadd.f32 %v769_v26, %v738_v21  ;;  %v788_v32 = vadd.f32 %v787_v27, %v751_v24 }
 0x11a   : > { %v789_v1 = vadd.f32 %v788_v32, %v752_v29  ;;  %v771_v35 = vadd.f32 %v770_v30, %v739_v33 }
 0x11c   : > { %v790_v38 = vadd.f32 %v789_v1, %v753_v34  ;;  %v772_v39 = vrot.slane %v771_v35, 4 }
 0x11e   : > { %v791_v40 = vadd.f32 %v790_v38, %v754_v37  ;;  %v773_v41 = vadd.f32 %v772_v39, %v771_v35 }
 0x120   : > { %v774_v43 = vrot.slane %v773_v41, 2  ;;  %v792_v45 = vadd.f32 %v791_v40, %v755_v28 }
 0x122   : > { %v793_v47 = vrot.slane %v792_v45, 4  ;;  %v775_v49 = vadd.f32 %v774_v43, %v773_v41 }
 0x124   : > { %v794_v51 = vadd.f32 %v793_v47, %v792_v45  ;;  %v776_v55 = vrot.slane %v775_v49, 1 }
 0x126   : > { %v795_v52 = vrot.slane %v794_v51, 2  ;;  %v777_v58 = vadd.f32 %v776_v55, %v775_v49 }
 0x128   : > { %v796_v42 = vadd.f32 %v795_v52, %v794_v51 }
 0x12a   : > { %v797_v56 = vrot.slane %v796_v42, 1 }
 0x12c   : > { %v798_v62 = vadd.f32 %v797_v56, %v796_v42 }
 0x12d   : > { %809 = sbr.rel (%p1060_p9) target bundleno = 527 (0x20f), region = 97 }
 0x12e   : > { %v802_v60 = vsel %vm801_vm0, %v798_v62, %v777_v58 }
 0x12f   : > { %v804_v63 = vadd.f32 %v802_v60, %v756_v61 }
 0x131   : > { %805 = vst [vmem:[#allocation2] sm:$0x3] %v804_v63 }
 0x132   : > { %v827_v46 = vld [vmem:[%s1489_s3 + $0x78] sm:$0xff]  ;;  %v826_v0 = vld [vmem:[%s1489_s3 + $0x70] sm:$0xff]  ;;  %v825_v2 = vld [vmem:[%s1489_s3 + $0x68] sm:$0xff]  ;;  %v1212_v15 = vmov 2.0   ;;  %vm852_vm1 = vcmask 1041408  }
 0x133   : > { %832 = vmatpush.msra.mxu0 %v827_v46  ;;  %v824_v3 = vld [vmem:[%s1489_s3 + $0x60] sm:$0xff]  ;;  %v823_v50 = vld [vmem:[%s1489_s3 + $0x58] sm:$0xff]  ;;  %v822_v4 = vld [vmem:[%s1489_s3 + $0x50] sm:$0xff]  ;;  %1151 = vrcp.f32 %v1212_v15 }
 0x134   : > { %v821_v5 = vld [vmem:[%s1489_s3 + $0x48] sm:$0xff]  ;;  %v820_v6 = vld [vmem:[%s1489_s3 + $0x40] sm:$0xff]  ;;  %v819_v7 = vld [vmem:[%s1489_s3 + $0x38] sm:$0xff] }
 0x135   : > { %833 = vmatpush.msra.mxu0 %v826_v0  ;;  %v818_v44 = vld [vmem:[%s1489_s3 + $0x30] sm:$0xff]  ;;  %v817_v8 = vld [vmem:[%s1489_s3 + $0x28] sm:$0xff]  ;;  %v816_v9 = vld [vmem:[%s1489_s3 + $0x20] sm:$0xff] }
 0x136   : > { %v815_v54 = vld [vmem:[%s1489_s3 + $0x18] sm:$0xff]  ;;  %v814_v10 = vld [vmem:[%s1489_s3 + $0x10] sm:$0xff]  ;;  %v813_v13 = vld [vmem:[%s1489_s3 + $0x8] sm:$0xff] }
 0x137   : > { %834 = vmatpush.msra.mxu0 %v825_v2  ;;  %v812_v14 = vld [vmem:[%s1489_s3] sm:$0xff] }
 0x138   : > { %v810_v11 = vld [vmem:[#allocation2] sm:$0x3] }
 0x139   : > { %835 = vmatpush.msra.mxu0 %v824_v3  ;;  %v811_v48 = vmul.f32 0.00390625, %v810_v11  ;;  %v1152_v16 = vpop.eup %1151  ;;  %v1148_v59 = vld [vmem:[%s1490_s4] ss:$0 sm:$0xff] }
 0x13a   : > { %v861_v17 = vmul.f32 2.0, %v1152_v16  ;;  %vm865_vm2 = vweird.f32 %v1152_v16  ;;  %v1149_v49 = vld [vmem:[%s1491_s5] ss:$0 sm:$0xff] }
 0x13b   : > { %836 = vmatpush.msra.mxu0 %v823_v50  ;;  %v1150_v55 = vld [vmem:[%s1492_s6] ss:$0 sm:$0xff] }
 0x13c   : > { %v862_v20 = vsub.f32 1.0, %v861_v17 }
 0x13d   : > { %837 = vmatpush.msra.mxu0 %v822_v4 }
 0x13e   : > { %v863_v12 = vmul.f32 %v1152_v16, %v862_v20 }
 0x13f   : > { %838 = vmatpush.msra.mxu0 %v821_v5 }
 0x140   : > { %v864_v24 = vadd.f32 %v1152_v16, %v863_v12 }
 0x141   : > { %839 = vmatpush.msra.mxu0 %v820_v6 }
 0x142   : > { %v866_v27 = vsel %vm865_vm2, %v1152_v16, %v864_v24 }
 0x143   : > { %840 = vmatpush.msra.mxu0 %v819_v7 }
 0x145   : > { %841 = vmatpush.msra.mxu0 %v818_v44 }
 0x147   : > { %842 = vmatpush.msra.mxu0 %v817_v8 }
 0x149   : > { %843 = vmatpush.msra.mxu0 %v816_v9 }
 0x14b   : > { %844 = vmatpush.msra.mxu0 %v815_v54 }
 0x14d   : > { %845 = vmatpush.msra.mxu0 %v814_v10 }
 0x14f   : > { %846 = vmatpush.msra.mxu0 %v813_v13 }
 0x151   : > { %847 = vmatpush.msra.mxu0 %v812_v14 }
 0x152   : > { %848 = vmatmul.f32.vlgmr.msra.gmra.mxu0 %v811_v48 }
 0x1cf   : > { %v849_v18 = vpop.f32.mrf.mxu0 }
 0x1d0   : > { %v850_v19 = vadd.f32 %v1148_v59, %v849_v18 }
 0x1d2   : > { %v853_v53 = vsel %vm852_vm1, %v850_v19, 0.0 }
 0x1d3   : > { %v854_v21 = vrot.slane %v853_v53, 4 }
 0x1d5   : > { %v855_v22 = vadd.f32 %v854_v21, %v853_v53 }
 0x1d7   : > { %v856_v23 = vrot.slane %v855_v22, 2 }
 0x1d9   : > { %v857_v25 = vadd.f32 %v856_v23, %v855_v22 }
 0x1db   : > { %v858_v26 = vrot.slane %v857_v25, 1 }
 0x1dd   : > { %v859_v29 = vadd.f32 %v858_v26, %v857_v25 }
 0x1df   : > { %v867_v57 = vmul.f32 %v866_v27, %v859_v29 }
 0x1e1   : > { %v868_v30 = vsub.f32 %v850_v19, %v867_v57 }
 0x1e3   : > { %v869_v31 = vmul.f32 %v868_v30, %v868_v30 }
 0x1e5   : > { %v870_v32 = vsel %vm852_vm1, %v869_v31, 0.0 }
 0x1e6   : > { %v871_v33 = vrot.slane %v870_v32, 4 }
 0x1e8   : > { %v872_v34 = vadd.f32 %v871_v33, %v870_v32 }
 0x1ea   : > { %v873_v1 = vrot.slane %v872_v34, 2 }
 0x1ec   : > { %v874_v35 = vadd.f32 %v873_v1, %v872_v34 }
 0x1ee   : > { %v875_v36 = vrot.slane %v874_v35, 1 }
 0x1f0   : > { %v876_v37 = vadd.f32 %v875_v36, %v874_v35 }
 0x1f2   : > { %v877_v38 = vmul.f32 %v876_v37, %v866_v27 }
 0x1f4   : > { %v878_v39 = vadd.f32 1e-05, %v877_v38 }
 0x1f6   : > { %1153 = vrsqrt.f32 %v878_v39  ;;  %vm885_vm4 = vweird.f32 %v878_v39 }
 0x1fc   : > { %v1154_v40 = vpop.eup %1153 }
 0x1fd   : > { %v880_v41 = vmul.f32 %v1154_v40, %v878_v39  ;;  %vm886_vm3 = vweird.f32 %v1154_v40 }
 0x1fe   : > { %vm887_vm5 = vmor %vm885_vm4, %vm886_vm3 }
 0x1ff   : > { %v881_v28 = vmul.f32 %v1154_v40, %v880_v41 }
 0x201   : > { %v882_v43 = vmul.f32 0.5, %v881_v28 }
 0x203   : > { %v883_v45 = vsub.f32 1.5, %v882_v43 }
 0x205   : > { %v884_v47 = vmul.f32 %v1154_v40, %v883_v45 }
 0x207   : > { %v888_v51 = vsel %vm887_vm5, %v1154_v40, %v884_v47 }
 0x208   : > { %v889_v52 = vmul.f32 %v888_v51, %v868_v30 }
 0x20a   : > { %v894_v42 = vmul.f32 %v1149_v49, %v889_v52 }
 0x20c   : > { %v899_v56 = vadd.f32 %v1150_v55, %v894_v42 }
 0x20e   : > { %900 = vst [vmem:[#allocation4] sm:$0x3] %v899_v56 }
 0x20f PF: > { %p1118_p10 = scmp.eq.s32.totalorder %s1270_s27, 1  ;;  %s1213_s18 = smov [#allocation4]  }
 0x210   : > { %s907_s19 = sshll.u32 %s1213_s18, 4  ;;  %s909_s22 = sshll.u32 %s1493_s7, 4  ;;  %s908_s19 = int_to_ptr.vmem [resolvable:$true] %s907_s19  ;;  %s910_s22 = int_to_ptr.hbm [resolvable:$true] %s909_s22 }
 0x211   : > { %1115 = dma.vmem_to_hbm [thread:$0]  (%p1118_p10), %s908_s19, 32, %s910_s22, [#allocation5]  }
 0x212   : > { %1196 = dma.done.wait (%p1118_p10), [#allocation5], 32  }
 0x213   : > { %1198 = vsyncadd (%p1118_p10), [#allocation5], 4294967264 }
 0x214 PF: > { %p15_p11 = scmp.ge.s32.totalorder %s1273_s28, 4   ;;  %s1494_s24 = smov %s1205_s25 }
 0x215   : > { %s1495_s25 = smov %s1282_s8  ;;  %s1496_s26 = smov %s1273_s28 }
 0x216   :  { %17 = sbr.rel (!%p15_p11) target bundleno = 2 (0x2), region = 129 }
 0x21b   :  { %923 = vsyncpa [#allocation5], 1 }
 0x21c   :  { %925 = vsyncpa [#allocation5 + $0x1], 1 }

</bundles_post_ra>
